<compile_context>
chip_gen: v5e
topology: v5e:2x2
jax: 0.10.0
libtpu: 0.0.40
codegen_flags: <defaults>
</compile_context>

<pallas_src>
import functools

import jax
import jax.numpy as jnp
from jax.experimental import pallas as pl
from jax.experimental.pallas import tpu as pltpu


def _round_up(x, m):
    return ((x + m - 1) // m) * m


def _dist_align_kernel(feat_ref, linw_ref, linb_ref, lwm1_ref, lb_ref,
                       logits_ref, out_ref, gate_ref):
    # Gate: z = sum_d feat[:, d] * w[d] + b  (lane reduction, not MXU).
    # Computed once per batch tile (class step 0) and kept in VMEM scratch
    # across class tiles.  NOTE: for a partial final batch tile the gate of
    # the out-of-bounds rows is garbage, but those output rows are masked
    # out by Pallas on store, so results for valid rows are unaffected.
    @pl.when(pl.program_id(1) == 0)
    def _():
        feat = feat_ref[...].astype(jnp.float32)                    # [TB, D]
        z = jnp.sum(feat * linw_ref[...], axis=-1, keepdims=True)   # [TB, 1]
        gate_ref[...] = jax.nn.sigmoid(z + linb_ref[0])

    logits = logits_ref[...].astype(jnp.float32)                    # [TB, TC]
    w1 = gate_ref[...]                                              # [TB, 1]
    # Folded blend:  w1*(lw*x + lb) + (1-w1)*x  ==  x + w1*((lw-1)*x + lb)
    out = logits + w1 * (lwm1_ref[...] * logits + lb_ref[...])
    out_ref[...] = out.astype(out_ref.dtype)


def distribution_alignment(features, logits, lin_w, lin_b, logitsweight,
                           logitsbias, *, max_block_rows=1024, out_dtype=None):
    """features: [B, D], logits: [B, C], lin_w: [D, 1] (nn.Linear weight^T),
    lin_b: scalar, logitsweight/logitsbias: [C].  Returns [B, C].

    features/logits may be bf16 (recommended for HBM bandwidth); compute is
    f32 inside the kernel.  Output dtype defaults to logits.dtype."""
    B, D = features.shape
    Bl, C = logits.shape
    assert Bl == B
    out_dtype = logits.dtype if out_dtype is None else out_dtype

    feat_b = jnp.dtype(features.dtype).itemsize
    in_b = jnp.dtype(logits.dtype).itemsize
    out_b = jnp.dtype(out_dtype).itemsize

    # ---------------- VMEM-budget-aware tile sizing ----------------
    try:
        vmem_cap = pltpu.get_tpu_info().vmem_capacity_bytes
    except Exception:
        vmem_cap = 64 << 20            # v7x per-TC capacity (most conservative)
    budget = min(vmem_cap // 2, 48 << 20)

    sub = 16 if B >= 16 else 8         # bf16 packs 16 sublanes per vreg

    def work(tb, tc):
        # Double-buffered streams + resident params + lane-padded gate scratch.
        return (2 * tb * D * feat_b            # features
                + 2 * tb * tc * in_b           # logits in
                + 2 * tb * tc * out_b          # output
                + 2 * (D + 2 * tc) * 4         # lin_w row, (lw-1), lb
                + tb * 128 * 4)                # gate scratch [TB,1] lane-padded

    # Target ~8 batch tiles so v7x's two TensorCores and the DMA pipeline
    # both have work, while keeping each tile at least `sub` rows.
    if B <= sub:
        tb = B
    else:
        tb = _round_up(max(pl.cdiv(B, 8), sub), sub)
        tb = min(tb, max_block_rows, _round_up(B, sub))

    tc = C
    # Shrink the batch tile first; if a full-C block still doesn't fit, tile
    # the class dim with 128-multiple tiles (lane-dense stores).
    while work(tb, tc) > budget and tb > sub:
        tb = max(sub, ((tb // 2) // sub) * sub)
    if work(tb, tc) > budget and C > 256:
        tc = 128
        t = 256
        c_cap = _round_up(C, 128)
        while t <= c_cap and work(tb, t) <= budget:
            tc = t
            t += 128

    num_b = pl.cdiv(B, tb)
    num_c = pl.cdiv(C, tc)
    grid = (num_b, num_c)

    vmem_limit = int(min(vmem_cap, max(work(tb, tc) + (8 << 20), 32 << 20)))

    # ---------------- parameter layouts ----------------
    # lin_w as a lane-dense [1, D] row (gate via lane reduction), scalar bias
    # in SMEM, (logitsweight - 1) / logitsbias as [1, C] VMEM-resident rows.
    linw_row = jnp.reshape(lin_w, (1, D)).astype(jnp.float32)
    linb_s = jnp.reshape(lin_b, (1,)).astype(jnp.float32)
    lwm1 = (jnp.reshape(logitsweight, (1, C)) - 1.0).astype(jnp.float32)
    lb2 = jnp.reshape(logitsbias, (1, C)).astype(jnp.float32)

    bytes_accessed = (B * D * feat_b + B * C * in_b + B * C * out_b
                      + (D + 2 * C) * 4 + 4)
    cost = pl.CostEstimate(flops=2 * B * D + 5 * B * C,
                           transcendentals=B,
                           bytes_accessed=bytes_accessed)

    return pl.pallas_call(
        _dist_align_kernel,
        out_shape=jax.ShapeDtypeStruct((B, C), out_dtype),
        grid_spec=pltpu.PrefetchScalarGridSpec(
            num_scalar_prefetch=0,
            grid=grid,
            in_specs=[
                pl.BlockSpec((tb, D), lambda i, j: (i, 0)),    # features (batch-tiled, re-used across class steps)
                pl.BlockSpec((1, D), lambda i, j: (0, 0)),     # lin_w row (resident)
                pl.BlockSpec(memory_space=pltpu.MemorySpace.SMEM),  # lin_b scalar
                pl.BlockSpec((1, tc), lambda i, j: (0, j)),    # logitsweight - 1
                pl.BlockSpec((1, tc), lambda i, j: (0, j)),    # logitsbias
                pl.BlockSpec((tb, tc), lambda i, j: (i, j)),   # logits (streamed)
            ],
            out_specs=pl.BlockSpec((tb, tc), lambda i, j: (i, j)),
            scratch_shapes=[pltpu.VMEM((tb, 1), jnp.float32)],  # gate w1
        ),
        compiler_params=pltpu.CompilerParams(
            dimension_semantics=("parallel", "arbitrary"),
            vmem_limit_bytes=vmem_limit),
        cost_estimate=cost,
    )(features, linw_row, linb_s, lwm1, lb2, logits)
    # TODO(synk): if an xprof trace on v7x shows exposed DMA between grid
    # steps, add pipeline_mode=pl.Buffered(3) on the logits/out BlockSpecs.


def distribution_alignment_ref(features, logits, lin_w, lin_b, logitsweight,
                               logitsbias):
    w1 = jax.nn.sigmoid(features @ lin_w + lin_b)            # [B, 1]
    return w1 * (logitsweight[None, :] * logits + logitsbias[None, :]) \
        + (1.0 - w1) * logits


if __name__ == "__main__":
    # Small shapes consistent with the module (feat_dim=512, num_classes=1000
    # scaled down).  C=200 exercises the non-128-multiple class dim (masked
    # trailing stores, no padding/slicing in the wrapper).
    B, D, C = 16, 128, 200

    key = jax.random.PRNGKey(0)
    k_feat, k_logits, k_lw, k_lb, k_w, k_b = jax.random.split(key, 6)

    features = jax.random.normal(k_feat, (B, D), dtype=jnp.float32)
    logits = jax.random.normal(k_logits, (B, C), dtype=jnp.float32)
    logitsweight = jax.random.normal(k_lw, (C,), dtype=jnp.float32)
    logitsbias = jax.random.normal(k_lb, (C,), dtype=jnp.float32)
    # nn.Linear(feat_dim, 1): weight [1, D] -> stored transposed as [D, 1]
    lin_w = jax.random.normal(k_w, (D, 1), dtype=jnp.float32) * (1.0 / D ** 0.5)
    lin_b = jax.random.normal(k_b, (), dtype=jnp.float32) * (1.0 / D ** 0.5)

    # f32 path: exact check against the reference.
    out = jax.block_until_ready(distribution_alignment(
        features, logits, lin_w, lin_b, logitsweight, logitsbias))
    ref = distribution_alignment_ref(features, logits, lin_w, lin_b,
                                     logitsweight, logitsbias)
    assert out.shape == (B, C)
    assert jnp.allclose(out, ref, atol=1e-5, rtol=1e-5), "f32 mismatch vs reference"

    # bf16 streaming path (perf recommendation: halves HBM traffic; compute
    # stays f32 inside the kernel).  Compare against a reference computed on
    # the same bf16-rounded inputs; remaining error is the bf16 output cast.
    feat_bf = features.astype(jnp.bfloat16)
    logits_bf = logits.astype(jnp.bfloat16)
    out_bf = jax.block_until_ready(distribution_alignment(
        feat_bf, logits_bf, lin_w, lin_b, logitsweight, logitsbias))
    ref_bf = distribution_alignment_ref(
        feat_bf.astype(jnp.float32), logits_bf.astype(jnp.float32),
        lin_w, lin_b, logitsweight, logitsbias)
    assert out_bf.shape == (B, C) and out_bf.dtype == jnp.bfloat16
    assert jnp.allclose(out_bf.astype(jnp.float32), ref_bf,
                        atol=5e-2, rtol=5e-2), "bf16 mismatch vs reference"

    print("KERNEL_OK")
</pallas_src>

<mosaic_0001>
module attributes {stable_mosaic.version = 11 : i64} {
  func.func @_dist_align_kernel(%arg0: i32, %arg1: i32, %arg2: memref<16x128xf32, #tpu.memory_space<vmem>>, %arg3: memref<1x128xf32, #tpu.memory_space<vmem>>, %arg4: memref<1xf32, #tpu.memory_space<smem>>, %arg5: memref<1x200xf32, #tpu.memory_space<vmem>>, %arg6: memref<1x200xf32, #tpu.memory_space<vmem>>, %arg7: memref<16x200xf32, #tpu.memory_space<vmem>>, %arg8: memref<16x200xf32, #tpu.memory_space<vmem>>, %arg9: memref<16x1xf32, #tpu.memory_space<vmem>>) attributes {dimension_semantics = [#tpu.dimension_semantics<parallel>, #tpu.dimension_semantics<arbitrary>], iteration_bounds = array<i64: 1, 1>, scalar_prefetch = 0 : i64, scratch_operands = 1 : i64, tpu.core_type = #tpu.core_type<tc>, window_params = [{transform_indices = @transform_0, window_bounds = array<i64: 16, 128>}, {pipeline_mode = #tpu.pipeline_mode<synchronous>, transform_indices = @transform_1, window_bounds = array<i64: 1, 128>}, {transform_indices = @transform_2, window_bounds = array<i64: 1>}, {transform_indices = @transform_3, window_bounds = array<i64: 1, 200>}, {transform_indices = @transform_4, window_bounds = array<i64: 1, 200>}, {transform_indices = @transform_5, window_bounds = array<i64: 16, 200>}, {transform_indices = @transform_6, window_bounds = array<i64: 16, 200>}]} {
    %c0_i32 = arith.constant 0 : i32
    %0 = arith.cmpi eq, %arg1, %c0_i32 : i32
    %1 = arith.extui %0 : i1 to i32
    %c0_i32_0 = arith.constant 0 : i32
    %2 = arith.cmpi ne, %1, %c0_i32_0 : i32
    scf.if %2 {
      %c0_10 = arith.constant 0 : index
      %c0_11 = arith.constant 0 : index
      %15 = vector.load %arg2[%c0_10, %c0_11] : memref<16x128xf32, #tpu.memory_space<vmem>>, vector<16x128xf32>
      %c0_12 = arith.constant 0 : index
      %c0_13 = arith.constant 0 : index
      %16 = vector.load %arg3[%c0_12, %c0_13] : memref<1x128xf32, #tpu.memory_space<vmem>>, vector<1x128xf32>
      %17 = vector.broadcast %16 : vector<1x128xf32> to vector<16x128xf32>
      %18 = arith.mulf %15, %17 : vector<16x128xf32>
      %cst = arith.constant dense<0.000000e+00> : vector<16xf32>
      %19 = vector.multi_reduction <add>, %18, %cst [1] : vector<16x128xf32> to vector<16xf32>
      %20 = vector.shape_cast %19 : vector<16xf32> to vector<16x1xf32>
      %c0_14 = arith.constant 0 : index
      %21 = memref.load %arg4[%c0_14] : memref<1xf32, #tpu.memory_space<smem>>
      %22 = vector.broadcast %21 : f32 to vector<16x1xf32>
      %23 = arith.addf %20, %22 : vector<16x1xf32>
      %24 = arith.negf %23 : vector<16x1xf32>
      %25 = math.exp %24 : vector<16x1xf32>
      %cst_15 = arith.constant 1.000000e+00 : f32
      %26 = vector.broadcast %cst_15 : f32 to vector<16x1xf32>
      %27 = arith.addf %26, %25 : vector<16x1xf32>
      %28 = arith.divf %26, %27 : vector<16x1xf32>
      %c0_16 = arith.constant 0 : index
      %c0_17 = arith.constant 0 : index
      %29 = vector.load %arg9[%c0_16, %c0_17] : memref<16x1xf32, #tpu.memory_space<vmem>>, vector<16x1xf32>
      tpu.vector_store %arg9[%c0_16, %c0_17], %28 {strides = array<i32>} : memref<16x1xf32, #tpu.memory_space<vmem>>, vector<16x1xf32>,
    } else {
    }
    %c0 = arith.constant 0 : index
    %c0_1 = arith.constant 0 : index
    %3 = vector.load %arg7[%c0, %c0_1] : memref<16x200xf32, #tpu.memory_space<vmem>>, vector<16x200xf32>
    %c0_2 = arith.constant 0 : index
    %c0_3 = arith.constant 0 : index
    %4 = vector.load %arg9[%c0_2, %c0_3] : memref<16x1xf32, #tpu.memory_space<vmem>>, vector<16x1xf32>
    %c0_4 = arith.constant 0 : index
    %c0_5 = arith.constant 0 : index
    %5 = vector.load %arg5[%c0_4, %c0_5] : memref<1x200xf32, #tpu.memory_space<vmem>>, vector<1x200xf32>
    %6 = vector.broadcast %5 : vector<1x200xf32> to vector<16x200xf32>
    %7 = arith.mulf %6, %3 : vector<16x200xf32>
    %c0_6 = arith.constant 0 : index
    %c0_7 = arith.constant 0 : index
    %8 = vector.load %arg6[%c0_6, %c0_7] : memref<1x200xf32, #tpu.memory_space<vmem>>, vector<1x200xf32>
    %9 = vector.broadcast %8 : vector<1x200xf32> to vector<16x200xf32>
    %10 = arith.addf %7, %9 : vector<16x200xf32>
    %11 = vector.broadcast %4 : vector<16x1xf32> to vector<16x200xf32>
    %12 = arith.mulf %11, %10 : vector<16x200xf32>
    %13 = arith.addf %3, %12 : vector<16x200xf32>
    %c0_8 = arith.constant 0 : index
    %c0_9 = arith.constant 0 : index
    %14 = vector.load %arg8[%c0_8, %c0_9] : memref<16x200xf32, #tpu.memory_space<vmem>>, vector<16x200xf32>
    tpu.vector_store %arg8[%c0_8, %c0_9], %13 {strides = array<i32>} : memref<16x200xf32, #tpu.memory_space<vmem>>, vector<16x200xf32>,
    return
  }
  func.func @transform_0(%arg0: i32, %arg1: i32) -> (i32, i32) {
    %c0_i32 = arith.constant 0 : i32
    %c0_i32_0 = arith.constant 0 : i32
    return %arg0, %c0_i32 : i32, i32
  }
  func.func @transform_1(%arg0: i32, %arg1: i32) -> (i32, i32) {
    %c0_i32 = arith.constant 0 : i32
    %c0_i32_0 = arith.constant 0 : i32
    %c0_i32_1 = arith.constant 0 : i32
    return %c0_i32, %c0_i32_0 : i32, i32
  }
  func.func @transform_2(%arg0: i32, %arg1: i32) -> i32 {
    %c0_i32 = arith.constant 0 : i32
    %c0_i32_0 = arith.constant 0 : i32
    return %c0_i32 : i32
  }
  func.func @transform_3(%arg0: i32, %arg1: i32) -> (i32, i32) {
    %c0_i32 = arith.constant 0 : i32
    %c0_i32_0 = arith.constant 0 : i32
    return %c0_i32, %arg1 : i32, i32
  }
  func.func @transform_4(%arg0: i32, %arg1: i32) -> (i32, i32) {
    %c0_i32 = arith.constant 0 : i32
    %c0_i32_0 = arith.constant 0 : i32
    return %c0_i32, %arg1 : i32, i32
  }
  func.func @transform_5(%arg0: i32, %arg1: i32) -> (i32, i32) {
    %c0_i32 = arith.constant 0 : i32
    return %arg0, %arg1 : i32, i32
  }
  func.func @transform_6(%arg0: i32, %arg1: i32) -> (i32, i32) {
    %c0_i32 = arith.constant 0 : i32
    return %arg0, %arg1 : i32, i32
  }
}

</mosaic_0001>

<bundles_post_ra>
// kernel: tpu_custom_call.1
= control target key start
LH: loop header
LB: loop body
LE: loop exit
PB: predicated region body
PF: predicated region fallthrough
CT: control target
= control target key end

     0   :  { %12 = vsyncpa [#allocation5], 0  ;;  %s399_s0 = inlined_call_operand.hbm [shape: f32[16,128], index: 0, kind: input, shape index: {}]   ;;  %s400_s1 = inlined_call_operand.hbm [shape: f32[1,128], index: 1, kind: input, shape index: {}]   ;;  %s401_s2 = inlined_call_operand.<no memory space> [shape: f32[1], index: 2, kind: input, shape index: {}]   ;;  %s402_s3 = inlined_call_operand.vmem [shape: f32[1,200], index: 3, kind: input, shape index: {}]   ;;  %s403_s4 = inlined_call_operand.vmem [shape: f32[1,200], index: 4, kind: input, shape index: {}]   ;;  %s404_s5 = inlined_call_operand.hbm [shape: f32[16,200], index: 5, kind: input, shape index: {}]   ;;  %s405_s6 = inlined_call_operand.hbm [shape: f32[16,200], index: 6, kind: output, shape index: {}]  }
   0x1   :  { %13 = vsyncpa [#allocation8], 0  ;;  %s33_s23 = sshll.u32 %s400_s1, 4  ;;  %s34_s23 = int_to_ptr.hbm [resolvable:$true] %s33_s23 }
   0x2   :  { %14 = vsyncpa [#allocation6], 0  ;;  %s324_s24 = smov [#allocation7]   ;;  %s19_s28 = sshll.u32 %s399_s0, 4  ;;  %s20_s28 = int_to_ptr.hbm [resolvable:$true] %s19_s28 }
   0x3   :  { %s35_s25 = sshll.u32 %s324_s24, 4  ;;  %s325_s29 = smov [#allocation4]   ;;  %s36_s25 = int_to_ptr.vmem [resolvable:$true] %s35_s25 }
   0x4   :  { %38 = dma.hbm_to_vmem [thread:$0]  %s34_s23, 16, %s36_s25, [#allocation8]  }
   0x5   :  { %s21_s30 = sshll.u32 %s325_s29, 4  ;;  %s326_s7 = smov 128   ;;  %s22_s30 = int_to_ptr.vmem [resolvable:$true] %s21_s30 }
   0x6   :  { %s327_s8 = smov 8   ;;  %s49_s1 = sshll.u32 %s404_s5, 4  ;;  %s50_s1 = int_to_ptr.hbm [resolvable:$true] %s49_s1 }
   0x7   :  { %27 = dma.hbm_to_vmem [thread:$0]  %s20_s28, 256, %s22_s30, [#allocation5], %s326_s7, %s326_s7, %s327_s8  }
   0x8   :  { %s328_s11 = smov [#allocation9]   ;;  %s329_s13 = smov 256  }
   0x9   :  { %s51_s12 = sshll.u32 %s328_s11, 4  ;;  %s330_s14 = smov 16   ;;  %s52_s12 = int_to_ptr.vmem [resolvable:$true] %s51_s12 }
   0xa   :  { %57 = dma.hbm_to_vmem [thread:$0]  %s50_s1, 512, %s52_s12, [#allocation8], %s329_s13, %s329_s13, %s330_s14  }
   0xb   :  { %318 = dma.done.wait [#allocation5], 256  }
   0xc   :  { %319 = vsyncadd [#allocation5], 4294967040 }
   0xd   :  { %320 = dma.done.wait [#allocation8], 528  }
   0xe   :  { %321 = vsyncadd [#allocation8], 4294966768  ;;  %v74_v0 = vld [vmem:[#allocation4] sm:$0xff]  ;;  %v213_v1 = vld [vmem:[#allocation7] ss:$0 sm:$0xff]  ;;  %v87_v5 = vstv %s401_s2  ;;  %v331_v9 = vmov 0  }
   0xf   :  { %v80_v2 = vmul.f32 %v213_v1, %v74_v0  ;;  %v75_v3 = vld [vmem:[#allocation4 + $0x8] sm:$0xff]  ;;  %211 = vset.pattern.permute.xlu1 %v331_v9  ;;  %212 = vset.pattern.permute.xlu0 %v331_v9  ;;  %vm128_vm2 = vcmask 7168   ;;  %v137_v39 = vld [vmem:[%s402_s3] sm:$0x3]  ;;  %v131_v42 = vld [vmem:[#allocation9] sm:$0xff]  ;;  %vm176_vm9 = vcmask 588800  }
  0x10   :  { %v81_v4 = vmul.f32 %v213_v1, %v75_v3  ;;  %v139_v40 = vperm.slane %v137_v39, 0  ;;  %v140_v41 = vperm.slane %v137_v39, 1  ;;  %v132_v43 = vld [vmem:[#allocation9 + $0x8] sm:$0xff]  ;;  %v147_v44 = vld [vmem:[%s403_s4] sm:$0x3]  ;;  %v133_v51 = vld [vmem:[#allocation9 + $0x10] sm:$0xff] }
  0x11   :  { %82 = vadd.xlane.f32.xlu0 %v80_v2  ;;  %v149_v47 = vperm.slane %v147_v44, 0  ;;  %v150_v48 = vperm.slane %v147_v44, 1  ;;  %v134_v52 = vld [vmem:[#allocation9 + $0x18] sm:$0xff]  ;;  %s332_s3 = smov [#allocation10]   ;;  %s186_s20 = sshll.u32 %s405_s6, 4  ;;  %s187_s20 = int_to_ptr.hbm [resolvable:$true] %s186_s20 }
  0x12   :  { %v143_v45 = vmul.f32 %v139_v40, %v131_v42  ;;  %v144_v46 = vmul.f32 %v140_v41, %v132_v43  ;;  %v145_v56 = vmul.f32 %v139_v40, %v133_v51  ;;  %v146_v57 = vmul.f32 %v140_v41, %v134_v52  ;;  %s184_s4 = sshll.u32 %s332_s3, 4  ;;  %s185_s4 = int_to_ptr.vmem [resolvable:$true] %s184_s4 }
  0x14   :  { %v153_v49 = vadd.f32 %v149_v47, %v143_v45  ;;  %v154_v50 = vadd.f32 %v150_v48, %v144_v46  ;;  %v155_v60 = vadd.f32 %v149_v47, %v145_v56  ;;  %v156_v61 = vadd.f32 %v150_v48, %v146_v57 }
  0x19   :  { %84 = vadd.xlane.f32.xlu0 %v81_v4 }
  0x84   :  { %v83_v6 = vpop.xlane.xlu0 %82 }
  0x85   :  { %v88_v7 = vadd.f32 %v87_v5, %v83_v6 }
  0x87   :  { %v200_v8 = vmul.f32 -1.442695, %v88_v7 }
  0x89   :  { %214 = vpow2.f32 %v200_v8 }
  0x8c   :  { %v85_v10 = vpop.xlane.xlu0 %84 }
  0x8d   :  { %v89_v11 = vadd.f32 %v87_v5, %v85_v10 }
  0x8f   :  { %v215_v12 = vpop.eup %214  ;;  %v201_v13 = vmul.f32 -1.442695, %v89_v11 }
  0x90   :  { %v96_v14 = vadd.f32 1.0, %v215_v12 }
  0x91   :  { %216 = vpow2.f32 %v201_v13 }
  0x92   :  { %218 = vrcp.f32 %v96_v14  ;;  %v109_v20 = vand.u32 2147483648, %v96_v14  ;;  %v107_v22 = vand.u32 2147483647, %v96_v14  ;;  %vm103_vm1 = vweird.f32 %v96_v14 }
  0x94   :  { %v110_v25 = vor.u32 1.1754944e-38, %v109_v20  ;;  %vm108_vm4 = vcmp.eq.f32.partialorder %v107_v22, 8.507059e+37 }
  0x97   :  { %v217_v15 = vpop.eup %216 }
  0x98   :  { %v219_v16 = vpop.eup %218  ;;  %v97_v17 = vadd.f32 1.0, %v217_v15 }
  0x99   :  { %v99_v18 = vmul.f32 %v219_v16, %v96_v14  ;;  %vm104_vm0 = vweird.f32 %v219_v16 }
  0x9a   :  { %220 = vrcp.f32 %v97_v17  ;;  %vm105_vm3 = vmor %vm103_vm1, %vm104_vm0  ;;  %v124_v30 = vand.u32 2147483648, %v97_v17  ;;  %v122_v32 = vand.u32 2147483647, %v97_v17  ;;  %vm118_vm6 = vweird.f32 %v97_v17 }
  0x9b   :  { %v100_v19 = vsub.f32 1.0, %v99_v18 }
  0x9c   :  { %v125_v34 = vor.u32 1.1754944e-38, %v124_v30  ;;  %vm123_vm8 = vcmp.eq.f32.partialorder %v122_v32, 8.507059e+37 }
  0x9d   :  { %v101_v21 = vmul.f32 %v219_v16, %v100_v19 }
  0x9f   :  { %v102_v23 = vadd.f32 %v219_v16, %v101_v21 }
  0xa0   :  { %v221_v24 = vpop.eup %220 }
  0xa1   :  { %v106_v26 = vsel %vm105_vm3, %v219_v16, %v102_v23  ;;  %v114_v27 = vmul.f32 %v221_v24, %v97_v17  ;;  %vm119_vm5 = vweird.f32 %v221_v24 }
  0xa2   :  { %v111_v28 = vsel %vm108_vm4, %v110_v25, %v106_v26  ;;  %vm120_vm7 = vmor %vm118_vm6, %vm119_vm5 }
  0xa3   :  { %129 = vst.msk [vmem:[#allocation2] sm:$0xff] %vm128_vm2, %v111_v28  ;;  %v115_v29 = vsub.f32 1.0, %v114_v27 }
  0xa5   :  { %v116_v31 = vmul.f32 %v221_v24, %v115_v29 }
  0xa7   :  { %v117_v33 = vadd.f32 %v221_v24, %v116_v31 }
  0xa9   :  { %v121_v35 = vsel %vm120_vm7, %v221_v24, %v117_v33 }
  0xaa   :  { %v126_v36 = vsel %vm123_vm8, %v125_v34, %v121_v35  ;;  %v135_v37 = vld [vmem:[#allocation2] sm:$0xff] }
  0xab   :  { %130 = vst.msk [vmem:[#allocation2 + $0x8] sm:$0xff] %vm128_vm2, %v126_v36  ;;  %159 = vperm.xlu1 %211, %v135_v37  }
  0xb2   :  { %v136_v38 = vld [vmem:[#allocation2 + $0x8] sm:$0xff] }
  0xb3   :  { %164 = vperm.xlu1 %211, %v136_v38  }
 0x11d   :  { %v160_v53 = vpop.permute.xlu1 %159 }
 0x11e   :  { %v167_v54 = vmul.f32 %v160_v53, %v153_v49  ;;  %v168_v55 = vmul.f32 %v160_v53, %v154_v50 }
 0x120   :  { %v171_v58 = vadd.f32 %v167_v54, %v131_v42  ;;  %v172_v59 = vadd.f32 %v168_v55, %v132_v43 }
 0x122   :  { %175 = vst [vmem:[#allocation10] sm:$0xff] %v171_v58 }
 0x123   :  { %177 = vst.msk [vmem:[#allocation10 + $0x8] sm:$0xff] %vm176_vm9, %v172_v59 }
 0x125   :  { %v165_v62 = vpop.permute.xlu1 %164 }
 0x126   :  { %v169_v63 = vmul.f32 %v165_v62, %v155_v60  ;;  %v170_v0 = vmul.f32 %v165_v62, %v156_v61 }
 0x128   :  { %v173_v1 = vadd.f32 %v169_v63, %v133_v51  ;;  %v174_v2 = vadd.f32 %v170_v0, %v134_v52 }
 0x12a   :  { %178 = vst [vmem:[#allocation10 + $0x10] sm:$0xff] %v173_v1 }
 0x12b   :  { %179 = vst.msk [vmem:[#allocation10 + $0x18] sm:$0xff] %vm176_vm9, %v174_v2 }
 0x12c   :  { %192 = dma.vmem_to_hbm [thread:$0]  %s185_s4, 512, %s187_s20, [#allocation6], %s329_s13, %s329_s13, %s330_s14  }
 0x12d   :  { %322 = dma.done.wait [#allocation6], 512  }
 0x12e   :  { %323 = vsyncadd [#allocation6], 4294966784 }
 0x12f   :  { %197 = vsyncpa [#allocation5], 1 }
 0x130   :  { %198 = vsyncpa [#allocation8], 1 }
 0x131   :  { %199 = vsyncpa [#allocation6], 1 }

</bundles_post_ra>
